<compile_context>
chip_gen: v5e
topology: v5e:2x2
jax: 0.10.0
libtpu: 0.0.40
codegen_flags: <defaults>
</compile_context>

<pallas_src>
import jax
import jax.numpy as jnp
from jax import lax
from jax.experimental import pallas as pl
from jax.experimental.pallas import tpu as pltpu


def value_net_kernel(x_ref, w1_ref, w2_ref, w3_ref, b_ref, o_ref):
    # x : (TB, obs)  natural batch-major tile (no wrapper transpose / pad)
    # w1: (H1, obs)  w2: (H2, H1)  w3: (H2, 1)
    # b : (H1+H2+1, 1) packed column [b1; b2; b3]
    # o : (1, TB)    lane-dense value row
    H1 = w1_ref.shape[0]
    H2 = w2_ref.shape[0]
    b1 = b_ref[0:H1, :]                      # (H1, 1)
    b2 = b_ref[H1:H1 + H2, :]                # (H2, 1)
    b3 = b_ref[H1 + H2:H1 + H2 + 1, :]       # (1, 1)

    # fc1 + ReLU: contract obs (last dim of BOTH operands) -> (H1, TB).
    # Batch stays on lanes; the small x re-layout happens in-kernel and is
    # hidden under the x DMA.
    h1 = lax.dot_general(w1_ref[...], x_ref[...],
                         dimension_numbers=(((1,), (1,)), ((), ())),
                         preferred_element_type=jnp.float32)
    h1 = jnp.maximum(h1 + b1, 0.0)

    # fc2 + ReLU -> (H2, TB)
    h2 = jnp.dot(w2_ref[...], h1.astype(w2_ref.dtype),
                 preferred_element_type=jnp.float32)
    h2 = jnp.maximum(h2 + b2, 0.0)

    # Value head (out_features = 1): VPU multiply + cross-sublane reduce.
    v = jnp.sum(h2 * w3_ref[...], axis=0, keepdims=True) + b3   # (1, TB)
    o_ref[...] = v.astype(o_ref.dtype)


def value_network_forward(x, params, *, tb=2048):
    """x: (B, obs) (f32 or bf16). params from init_params (PyTorch-layout
    weights, packed f32 biases). Returns (B, 1) f32 values.

    tb: batch tile.  2048-8192 recommended for large rollout batches; on v7x
    prefer keeping ceil(B/tb) >= 2 (ideally >= 4, even) so both TensorCores
    are fed via the "parallel" grid axis.
    """
    w1, w2, w3, b = params["w1"], params["w2"], params["w3"], params["b"]
    B, obs = x.shape
    H1, H2 = w1.shape[0], w2.shape[0]
    assert b.shape == (H1 + H2 + 1, 1)

    if B <= tb:
        TB = B                                  # single (possibly ragged) tile
    else:
        assert tb % 128 == 0, "batch tile must be lane-aligned when tiling"
        TB = tb
    num_tiles = pl.cdiv(B, TB)                  # last tile may be partial (masked)

    out = pl.pallas_call(
        value_net_kernel,
        out_shape=jax.ShapeDtypeStruct((1, B), jnp.float32),
        grid=(num_tiles,),
        in_specs=[
            # x tile, natural layout, pipelined per grid step.
            # (add pipeline_mode=pl.Buffered(3) here if DMA is still exposed)
            pl.BlockSpec((TB, obs), lambda i: (i, 0)),
            pl.BlockSpec(w1.shape, lambda i: (0, 0)),   # weights: VMEM-resident
            pl.BlockSpec(w2.shape, lambda i: (0, 0)),
            pl.BlockSpec(w3.shape, lambda i: (0, 0)),
            pl.BlockSpec(b.shape, lambda i: (0, 0)),    # packed biases: one DMA
        ],
        out_specs=pl.BlockSpec((1, TB), lambda i: (0, i)),  # lane-dense value row
        compiler_params=pltpu.CompilerParams(
            dimension_semantics=("parallel",),          # megacore shard on v7x
            vmem_limit_bytes=32 * 1024 * 1024,          # explicit (v5e default 16 MiB)
        ),
    )(x, w1, w2, w3, b)

    return out[0].reshape(B, 1)


def value_network_reference(x, params):
    """Pure-JAX reference with PyTorch Linear semantics (y = x @ W.T + b)."""
    H1, H2 = params["w1"].shape[0], params["w2"].shape[0]
    bcol = params["b"][:, 0]
    b1, b2, b3 = bcol[:H1], bcol[H1:H1 + H2], bcol[H1 + H2:]
    h1 = jnp.maximum(x @ params["w1"].T + b1, 0.0)
    h2 = jnp.maximum(h1 @ params["w2"].T + b2, 0.0)
    return h2 @ params["w3"] + b3              # w3 stored as (H2, 1)


def init_params(key, obs_space_dims, hidden1, hidden2):
    """Deterministic synthetic init (uniform, PyTorch-default-like scale)."""
    ks = jax.random.split(key, 6)

    def lin(kw, kb, fan_in, fan_out):
        bound = 1.0 / (float(fan_in) ** 0.5)
        w = jax.random.uniform(kw, (fan_out, fan_in), jnp.float32, -bound, bound)
        b = jax.random.uniform(kb, (fan_out,), jnp.float32, -bound, bound)
        return w, b

    w1, b1 = lin(ks[0], ks[1], obs_space_dims, hidden1)   # (H1, obs)
    w2, b2 = lin(ks[2], ks[3], hidden1, hidden2)          # (H2, H1)
    w3, b3 = lin(ks[4], ks[5], hidden2, 1)                # (1, H2)
    return {
        "w1": w1,
        "w2": w2,
        "w3": w3.T,                                       # (H2, 1) column for VPU head
        "b": jnp.concatenate([b1, b2, b3]).reshape(-1, 1),  # (H1+H2+1, 1): one DMA
    }


if __name__ == "__main__":
    obs_space_dims, hidden1, hidden2 = 16, 32, 32

    key = jax.random.PRNGKey(0)
    kx, kp, kx2, kx3 = jax.random.split(key, 4)
    params = init_params(kp, obs_space_dims, hidden1, hidden2)

    # 1) Small single-tile case (B=8).
    x = jax.random.normal(kx, (8, obs_space_dims), jnp.float32)
    out = jax.block_until_ready(value_network_forward(x, params))
    ref = value_network_reference(x, params)
    assert out.shape == (8, 1)
    assert jnp.allclose(out, ref, atol=1e-4, rtol=1e-4)

    # 2) Multi-tile with ragged last tile (B=1000, tb=256 -> 4 tiles, last partial;
    #    no padded copy of x, output stores masked by Pallas).
    x2 = jax.random.normal(kx2, (1000, obs_space_dims), jnp.float32)
    out2 = jax.block_until_ready(value_network_forward(x2, params, tb=256))
    ref2 = value_network_reference(x2, params)
    assert out2.shape == (1000, 1)
    assert jnp.allclose(out2, ref2, atol=1e-4, rtol=1e-4)

    # 3) Default big-tile path (B=4096, tb=2048 -> 2 exact tiles; feeds both TCs on v7x).
    x3 = jax.random.normal(kx3, (4096, obs_space_dims), jnp.float32)
    out3 = jax.block_until_ready(value_network_forward(x3, params))
    ref3 = value_network_reference(x3, params)
    assert out3.shape == (4096, 1)
    assert jnp.allclose(out3, ref3, atol=1e-4, rtol=1e-4)

    # 4) bf16 streaming path: x and weights in bf16 (halves the dominant HBM
    #    stream), biases + accumulation stay f32.  Compare against an f32
    #    reference built from the same bf16-quantized operands.
    params_bf16 = dict(params)
    for name in ("w1", "w2", "w3"):
        params_bf16[name] = params[name].astype(jnp.bfloat16)
    x3_bf16 = x3.astype(jnp.bfloat16)
    out4 = jax.block_until_ready(value_network_forward(x3_bf16, params_bf16))
    params_bf16_up = {k: (v.astype(jnp.float32) if v.dtype == jnp.bfloat16 else v)
                      for k, v in params_bf16.items()}
    ref4 = value_network_reference(x3_bf16.astype(jnp.float32), params_bf16_up)
    assert out4.shape == (4096, 1)
    assert jnp.allclose(out4, ref4, atol=5e-2, rtol=5e-2)

    print("KERNEL_OK")
</pallas_src>

<mosaic_0001>
module attributes {stable_mosaic.version = 11 : i64} {
  func.func @value_net_kernel(%arg0: i32, %arg1: memref<8x16xf32, #tpu.memory_space<vmem>>, %arg2: memref<32x16xf32, #tpu.memory_space<vmem>>, %arg3: memref<32x32xf32, #tpu.memory_space<vmem>>, %arg4: memref<32x1xf32, #tpu.memory_space<vmem>>, %arg5: memref<65x1xf32, #tpu.memory_space<vmem>>, %arg6: memref<1x8xf32, #tpu.memory_space<vmem>>) attributes {dimension_semantics = [#tpu.dimension_semantics<parallel>], iteration_bounds = array<i64: 1>, scalar_prefetch = 0 : i64, scratch_operands = 0 : i64, tpu.core_type = #tpu.core_type<tc>, window_params = [{transform_indices = @transform_0, window_bounds = array<i64: 8, 16>}, {pipeline_mode = #tpu.pipeline_mode<synchronous>, transform_indices = @transform_1, window_bounds = array<i64: 32, 16>}, {pipeline_mode = #tpu.pipeline_mode<synchronous>, transform_indices = @transform_2, window_bounds = array<i64: 32, 32>}, {pipeline_mode = #tpu.pipeline_mode<synchronous>, transform_indices = @transform_3, window_bounds = array<i64: 32, 1>}, {pipeline_mode = #tpu.pipeline_mode<synchronous>, transform_indices = @transform_4, window_bounds = array<i64: 65, 1>}, {transform_indices = @transform_5, window_bounds = array<i64: 1, 8>}]} {
    %c0 = arith.constant 0 : index
    %c0_0 = arith.constant 0 : index
    %0 = vector.load %arg5[%c0, %c0_0] : memref<65x1xf32, #tpu.memory_space<vmem>>, vector<32x1xf32>
    %c32 = arith.constant 32 : index
    %c0_1 = arith.constant 0 : index
    %1 = vector.load %arg5[%c32, %c0_1] : memref<65x1xf32, #tpu.memory_space<vmem>>, vector<32x1xf32>
    %c64 = arith.constant 64 : index
    %c0_2 = arith.constant 0 : index
    %2 = vector.load %arg5[%c64, %c0_2] : memref<65x1xf32, #tpu.memory_space<vmem>>, vector<1x1xf32>
    %c0_3 = arith.constant 0 : index
    %c0_4 = arith.constant 0 : index
    %3 = vector.load %arg2[%c0_3, %c0_4] : memref<32x16xf32, #tpu.memory_space<vmem>>, vector<32x16xf32>
    %c0_5 = arith.constant 0 : index
    %c0_6 = arith.constant 0 : index
    %4 = vector.load %arg1[%c0_5, %c0_6] : memref<8x16xf32, #tpu.memory_space<vmem>>, vector<8x16xf32>
    %cst = arith.constant dense<0.000000e+00> : vector<32x8xf32>
    %5 = tpu.matmul %3, %4, %cst {dimension_numbers = #tpu.dot_dimension_numbers<[1], [1], [0], [0], [0, 0, 1, 0], [], []>} : vector<32x16xf32>, vector<8x16xf32>, vector<32x8xf32> -> vector<32x8xf32>
    %6 = vector.broadcast %0 : vector<32x1xf32> to vector<32x8xf32>
    %7 = arith.addf %5, %6 : vector<32x8xf32>
    %cst_7 = arith.constant 0.000000e+00 : f32
    %8 = vector.broadcast %cst_7 : f32 to vector<32x8xf32>
    %9 = arith.maximumf %7, %8 : vector<32x8xf32>
    %c0_8 = arith.constant 0 : index
    %c0_9 = arith.constant 0 : index
    %10 = vector.load %arg3[%c0_8, %c0_9] : memref<32x32xf32, #tpu.memory_space<vmem>>, vector<32x32xf32>
    %cst_10 = arith.constant dense<0.000000e+00> : vector<32x8xf32>
    %11 = tpu.matmul %10, %9, %cst_10 {dimension_numbers = #tpu.dot_dimension_numbers<[1], [0], [0], [1], [0, 0, 1, 1], [], []>} : vector<32x32xf32>, vector<32x8xf32>, vector<32x8xf32> -> vector<32x8xf32>
    %12 = vector.broadcast %1 : vector<32x1xf32> to vector<32x8xf32>
    %13 = arith.addf %11, %12 : vector<32x8xf32>
    %cst_11 = arith.constant 0.000000e+00 : f32
    %14 = vector.broadcast %cst_11 : f32 to vector<32x8xf32>
    %15 = arith.maximumf %13, %14 : vector<32x8xf32>
    %c0_12 = arith.constant 0 : index
    %c0_13 = arith.constant 0 : index
    %16 = vector.load %arg4[%c0_12, %c0_13] : memref<32x1xf32, #tpu.memory_space<vmem>>, vector<32x1xf32>
    %17 = vector.broadcast %16 : vector<32x1xf32> to vector<32x8xf32>
    %18 = arith.mulf %15, %17 : vector<32x8xf32>
    %cst_14 = arith.constant dense<0.000000e+00> : vector<8xf32>
    %19 = vector.multi_reduction <add>, %18, %cst_14 [0] : vector<32x8xf32> to vector<8xf32>
    %20 = vector.shape_cast %19 : vector<8xf32> to vector<1x8xf32>
    %21 = vector.broadcast %2 : vector<1x1xf32> to vector<1x8xf32>
    %22 = arith.addf %20, %21 : vector<1x8xf32>
    %c0_15 = arith.constant 0 : index
    %c0_16 = arith.constant 0 : index
    %23 = vector.load %arg6[%c0_15, %c0_16] : memref<1x8xf32, #tpu.memory_space<vmem>>, vector<1x8xf32>
    tpu.vector_store %arg6[%c0_15, %c0_16], %22 {strides = array<i32>} : memref<1x8xf32, #tpu.memory_space<vmem>>, vector<1x8xf32>,
    return
  }
  func.func @transform_0(%arg0: i32) -> (i32, i32) {
    %c0_i32 = arith.constant 0 : i32
    %c0_i32_0 = arith.constant 0 : i32
    return %arg0, %c0_i32 : i32, i32
  }
  func.func @transform_1(%arg0: i32) -> (i32, i32) {
    %c0_i32 = arith.constant 0 : i32
    %c0_i32_0 = arith.constant 0 : i32
    %c0_i32_1 = arith.constant 0 : i32
    return %c0_i32, %c0_i32_0 : i32, i32
  }
  func.func @transform_2(%arg0: i32) -> (i32, i32) {
    %c0_i32 = arith.constant 0 : i32
    %c0_i32_0 = arith.constant 0 : i32
    %c0_i32_1 = arith.constant 0 : i32
    return %c0_i32, %c0_i32_0 : i32, i32
  }
  func.func @transform_3(%arg0: i32) -> (i32, i32) {
    %c0_i32 = arith.constant 0 : i32
    %c0_i32_0 = arith.constant 0 : i32
    %c0_i32_1 = arith.constant 0 : i32
    return %c0_i32, %c0_i32_0 : i32, i32
  }
  func.func @transform_4(%arg0: i32) -> (i32, i32) {
    %c0_i32 = arith.constant 0 : i32
    %c0_i32_0 = arith.constant 0 : i32
    %c0_i32_1 = arith.constant 0 : i32
    return %c0_i32, %c0_i32_0 : i32, i32
  }
  func.func @transform_5(%arg0: i32) -> (i32, i32) {
    %c0_i32 = arith.constant 0 : i32
    %c0_i32_0 = arith.constant 0 : i32
    return %c0_i32, %arg0 : i32, i32
  }
}

</mosaic_0001>

<bundles_post_ra>
// kernel: tpu_custom_call.1
= control target key start
LH: loop header
LB: loop body
LE: loop exit
PB: predicated region body
PF: predicated region fallthrough
CT: control target
= control target key end

     0   :  { %vm55_vm0 = vcmask 130048   ;;  %v285_v2 = vmov 0   ;;  %s392_s0 = inlined_call_operand.vmem [shape: f32[8,16], index: 0, kind: input, shape index: {}]   ;;  %s393_s1 = inlined_call_operand.vmem [shape: f32[32,16], index: 1, kind: input, shape index: {}]   ;;  %s394_s2 = inlined_call_operand.vmem [shape: f32[32,32], index: 2, kind: input, shape index: {}]   ;;  %s395_s3 = inlined_call_operand.vmem [shape: f32[32,1], index: 3, kind: input, shape index: {}]   ;;  %s396_s4 = inlined_call_operand.vmem [shape: f32[65,1], index: 4, kind: input, shape index: {}]   ;;  %s397_s5 = inlined_call_operand.hbm [shape: f32[1,8], index: 5, kind: output, shape index: {}]  }
   0x1   :  { %v34_v0 = vld [vmem:[%s392_s0] sm:$0xff]  ;;  %v24_v1 = vld [vmem:[%s396_s4 + $0x18] sm:$0xff]  ;;  %256 = vset.pattern.permute.xlu0 %v285_v2  ;;  %v31_v3 = vld [vmem:[%s393_s1 + $0x8] sm:$0xff]  ;;  %257 = vset.pattern.permute.xlu1 %v285_v2 }
   0x2   :  { %249 = vmatpush.xpose.msk.msra.mxu3 %vm55_vm0, %v34_v0  ;;  %v22_v4 = vld [vmem:[%s396_s4 + $0x8] sm:$0xff]  ;;  %52 = vperm.xlu0 %256, %v24_v1   ;;  %v30_v5 = vld [vmem:[%s393_s1] sm:$0xff] }
   0x3   :  { %42 = vperm.xlu1 %257, %v22_v4   ;;  %240 = vmatpush.xpose.msk.msra.mxu0 %vm55_vm0, %v34_v0 }
   0x4   :  { %258 = vset.pattern.permute.xlu2 %v285_v2 }
   0x5   :  { %242 = vmatmul.msk.f32.vlgmr.msra.gmra.mxu3 %vm55_vm0, %v31_v3 }
   0x6   :  { %10 = vsyncpa [#allocation3], 0  ;;  %241 = vmatmul.msk.f32.vlgmr.msra.gmra.mxu0 %vm55_vm0, %v30_v5  ;;  %v23_v6 = vld [vmem:[%s396_s4 + $0x10] sm:$0xff]  ;;  %v21_v7 = vld [vmem:[%s396_s4] sm:$0xff]  ;;  %vm128_vm1 = vcmask 261120   ;;  %vm202_vm2 = vcmask 64512  }
   0x7   :  { %v32_v8 = vld [vmem:[%s393_s1 + $0x10] sm:$0xff]  ;;  %v28_v10 = vld [vmem:[%s396_s4 + $0x38] sm:$0xff]  ;;  %v175_v12 = vld [vmem:[%s395_s3 + $0x8] sm:$0xff]  ;;  %s231_s10 = sshll.u32 %s397_s5, 4  ;;  %vm222_vm3 = vcmask 57344   ;;  %s232_s10 = int_to_ptr.hbm [resolvable:$true] %s231_s10 }
   0x8   :  { %v27_v9 = vld [vmem:[%s396_s4 + $0x30] sm:$0xff]  ;;  %v33_v11 = vld [vmem:[%s393_s1 + $0x18] sm:$0xff]  ;;  %v29_v14 = vld [vmem:[%s396_s4 + $0x40] sm:$0x1] }
   0x9   :  { %v176_v13 = vld [vmem:[%s395_s3 + $0x10] sm:$0xff]  ;;  %v25_v15 = vld [vmem:[%s396_s4 + $0x20] sm:$0xff]  ;;  %v26_v17 = vld [vmem:[%s396_s4 + $0x28] sm:$0xff] }
   0xa   :  { %47 = vperm.xlu0 %256, %v23_v6   ;;  %110 = vperm.xlu2 %258, %v25_v15   ;;  %v174_v21 = vld [vmem:[%s395_s3] sm:$0xff]  ;;  %v177_v29 = vld [vmem:[%s395_s3 + $0x18] sm:$0xff]  ;;  %v106_v36 = vld [vmem:[%s394_s2 + $0x10] sm:$0xff] }
   0xb   :  { %37 = vperm.xlu1 %257, %v21_v7   ;;  %v104_v35 = vld [vmem:[%s394_s2] sm:$0xff]  ;;  %v105_v37 = vld [vmem:[%s394_s2 + $0x8] sm:$0xff]  ;;  %v107_v38 = vld [vmem:[%s394_s2 + $0x18] sm:$0xff]  ;;  %s286_s2 = smov [#allocation2]  }
   0xc   :  { %s229_s7 = sshll.u32 %s286_s2, 4  ;;  %s230_s7 = int_to_ptr.vmem [resolvable:$true] %s229_s7 }
   0xd   :  { %243 = vmatmul.msk.f32.gmra.mxu3 %vm55_vm0, %v32_v8 }
  0x12   :  { %120 = vperm.xlu0 %256, %v27_v9   ;;  %115 = vperm.xlu2 %258, %v26_v17  }
  0x13   :  { %125 = vperm.xlu1 %257, %v28_v10  }
  0x15   :  { %244 = vmatmul.msk.f32.gmra.mxu3 %vm55_vm0, %v33_v11 }
  0x1a   :  { %185 = vperm.xlu0 %256, %v175_v12   ;;  %180 = vperm.xlu2 %258, %v174_v21  }
  0x1b   :  { %190 = vperm.xlu1 %257, %v176_v13  }
  0x22   :  { %218 = vperm.xlu0 %256, %v29_v14   ;;  %195 = vperm.xlu2 %258, %v177_v29  }
  0x64   :  { %v111_v39 = vpop.permute.xlu2 %110 }
  0x6c   :  { %v116_v40 = vpop.permute.xlu2 %115 }
  0x74   :  { %v53_v18 = vpop.permute.xlu0 %52  ;;  %v181_v48 = vpop.permute.xlu2 %180 }
  0x75   :  { %v43_v20 = vpop.permute.xlu1 %42 }
  0x7c   :  { %v48_v22 = vpop.permute.xlu0 %47  ;;  %v196_v0 = vpop.permute.xlu2 %195 }
  0x7d   :  { %v38_v30 = vpop.permute.xlu1 %37 }
  0x83   :  { %v88_v26 = vpop.f32.mrf.mxu0 }
  0x84   :  { %v89_v32 = vadd.f32 %v88_v26, %v38_v30  ;;  %v121_v42 = vpop.permute.xlu0 %120 }
  0x85   :  { %v126_v44 = vpop.permute.xlu1 %125 }
  0x86   :  { %v100_v34 = vmax.f32 %v89_v32, 0.0 }
  0x88   :  { %v91_v16 = vpop.f32.mrf.mxu3 }
  0x89   :  { %v92_v27 = vadd.f32 %v91_v16, %v43_v20 }
  0x8b   :  { %v101_v33 = vmax.f32 %v92_v27, 0.0 }
  0x8c   :  { %v186_v54 = vpop.permute.xlu0 %185 }
  0x8d   :  { %v191_v56 = vpop.permute.xlu1 %190 }
  0x90   :  { %v94_v19 = vpop.f32.mrf.mxu3 }
  0x91   :  { %v95_v24 = vadd.f32 %v94_v19, %v48_v22 }
  0x93   :  { %v102_v31 = vmax.f32 %v95_v24, 0.0 }
  0x94   :  { %v219_v12 = vpop.permute.xlu0 %218 }
  0x98   :  { %v97_v23 = vpop.f32.mrf.mxu3 }
  0x99   :  { %v98_v25 = vadd.f32 %v97_v23, %v53_v18 }
  0x9b   :  { %v103_v28 = vmax.f32 %v98_v25, 0.0 }
  0x9d   :  { %153 = vmatpush.msra.mxu1 %v103_v28  ;;  %250 = vmatpush.msra.mxu2 %v103_v28 }
  0x9f   :  { %154 = vmatpush.msra.mxu1 %v102_v31  ;;  %251 = vmatpush.msra.mxu2 %v102_v31 }
  0xa1   :  { %155 = vmatpush.msra.mxu1 %v101_v33  ;;  %252 = vmatpush.msra.mxu2 %v101_v33 }
  0xa3   :  { %156 = vmatpush.msra.mxu1 %v100_v34  ;;  %253 = vmatpush.msra.mxu2 %v100_v34 }
  0xa4   :  { %245 = vmatmul.msk.f32.vlgmr.msra.gmra.mxu1 %vm128_vm1, %v104_v35  ;;  %247 = vmatmul.msk.f32.vlgmr.msra.gmra.mxu2 %vm128_vm1, %v106_v36 }
  0xac   :  { %246 = vmatmul.msk.f32.gmra.mxu1 %vm128_vm1, %v105_v37  ;;  %248 = vmatmul.msk.f32.gmra.mxu2 %vm128_vm1, %v107_v38 }
 0x121   :  { %v158_v41 = vpop.f32.mrf.mxu1 }
 0x122   :  { %v159_v43 = vadd.f32 %v158_v41, %v111_v39 }
 0x124   :  { %v170_v46 = vmax.f32 %v159_v43, 0.0 }
 0x126   :  { %v198_v51 = vmul.f32 %v181_v48, %v170_v46 }
 0x127   :  { %v164_v45 = vpop.f32.mrf.mxu2 }
 0x128   :  { %v165_v47 = vadd.f32 %v164_v45, %v121_v42  ;;  %v203_v58 = vsel %vm202_vm2, %v198_v51, 0.0 }
 0x129   :  { %v161_v49 = vpop.f32.mrf.mxu1 }
 0x12a   :  { %v162_v50 = vadd.f32 %v161_v49, %v116_v40  ;;  %v172_v52 = vmax.f32 %v165_v47, 0.0 }
 0x12c   :  { %v171_v53 = vmax.f32 %v162_v50, 0.0  ;;  %v200_v59 = vmul.f32 %v191_v56, %v172_v52 }
 0x12e   :  { %v199_v55 = vmul.f32 %v186_v54, %v171_v53  ;;  %v206_v1 = vsel %vm202_vm2, %v200_v59, 0.0 }
 0x12f   :  { %v167_v57 = vpop.f32.mrf.mxu2 }
 0x130   :  { %v204_v60 = vsel %vm202_vm2, %v199_v55, 0.0  ;;  %v168_v61 = vadd.f32 %v167_v57, %v126_v44 }
 0x131   :  { %v205_v62 = vadd.f32 %v204_v60, %v203_v58 }
 0x132   :  { %v173_v63 = vmax.f32 %v168_v61, 0.0 }
 0x133   :  { %v207_v3 = vadd.f32 %v206_v1, %v205_v62 }
 0x134   :  { %v201_v2 = vmul.f32 %v196_v0, %v173_v63 }
 0x136   :  { %v208_v4 = vsel %vm202_vm2, %v201_v2, 0.0 }
 0x137   :  { %v209_v5 = vadd.f32 %v208_v4, %v207_v3 }
 0x139   :  { %v210_v6 = vrot.slane %v209_v5, 4 }
 0x13b   :  { %v211_v7 = vadd.f32 %v210_v6, %v209_v5 }
 0x13d   :  { %v212_v8 = vrot.slane %v211_v7, 2 }
 0x13f   :  { %v213_v9 = vadd.f32 %v212_v8, %v211_v7 }
 0x141   :  { %v214_v10 = vrot.slane %v213_v9, 1 }
 0x143   :  { %v215_v11 = vadd.f32 %v214_v10, %v213_v9 }
 0x145   :  { %v221_v13 = vadd.f32 %v219_v12, %v215_v11 }
 0x147   :  { %223 = vst.msk [vmem:[#allocation2] sm:$0x1] %vm222_vm3, %v221_v13 }
 0x148   :  { %234 = dma.vmem_to_hbm [thread:$0]  %s230_s7, 16, %s232_s10, [#allocation3]  }
 0x149   :  { %283 = dma.done.wait [#allocation3], 16  }
 0x14a   :  { %284 = vsyncadd [#allocation3], 4294967280 }
 0x14b   :  { %239 = vsyncpa [#allocation3], 1 }

</bundles_post_ra>
